<compile_context>
chip_gen: v7x
topology: tpu7x:2x2x1
jax: 0.10.0
libtpu: 0.0.40
codegen_flags: <defaults>
</compile_context>

<pallas_src>
import functools

import jax
import jax.numpy as jnp
from jax.experimental import pallas as pl
from jax.experimental.pallas import tpu as pltpu

LANE = 128     # vreg lane width  — output last dim padded to a multiple of this
SUBLANE = 8    # vreg sublane width — batch tile must be a multiple of this


def linear_kernel(x_ref, w_ref, b_ref, o_ref):
    # MXU matmul with explicit f32 accumulation; bias add rides a free VPU slot.
    # Output block is lane-dense (last dim = 128k) -> unmasked vst, no vst.msk.
    o_ref[...] = (
        jnp.dot(x_ref[...], w_ref[...], preferred_element_type=jnp.float32)
        + b_ref[...]
    ).astype(o_ref.dtype)


def _round_up(n, m):
    return ((n + m - 1) // m) * m


@functools.partial(jax.jit, static_argnames=("block_b",))
def mlp_forward(x, w, b, *, block_b=512):
    """MLP.forward: y = x @ w.T + b.

    x: (B, D) f32, w: (10, D) f32 (PyTorch layout), b: (10,) f32 -> (B, 10) f32.
    """
    B, D = x.shape
    O = w.shape[0]

    # ---- wrapper-side layout plumbing (no compute hoisted out of the kernel) ----
    # Zero-pad the out-feature (lane) dim to a multiple of 128.
    O_pad = _round_up(O, LANE)
    w_t = jnp.zeros((D, O_pad), jnp.float32).at[:, :O].set(
        jnp.transpose(w).astype(jnp.float32)
    )
    b_row = jnp.zeros((1, O_pad), jnp.float32).at[:, :O].set(b.astype(jnp.float32))

    # Batch tile: largest tile up to block_b rows, multiple of 8 sublanes.
    # (block_b=512 keeps double-buffered tiles far under v7x's 64 MiB VMEM.)
    tb = block_b if B >= block_b else _round_up(B, SUBLANE)
    B_pad = _round_up(B, tb)
    x_p = x if B_pad == B else jnp.pad(x, ((0, B_pad - B), (0, 0)))

    grid = (B_pad // tb,)

    cost = pl.CostEstimate(
        flops=2 * B_pad * D * O_pad,
        transcendentals=0,
        bytes_accessed=4 * (B_pad * D + D * O_pad + O_pad + B_pad * O_pad),
    )

    out = pl.pallas_call(
        linear_kernel,
        out_shape=jax.ShapeDtypeStruct((B_pad, O_pad), jnp.float32),
        grid_spec=pl.GridSpec(
            grid=grid,
            in_specs=[
                pl.BlockSpec((tb, D), lambda i: (i, 0)),      # x: streams over batch
                pl.BlockSpec((D, O_pad), lambda i: (0, 0)),   # weight: resident
                pl.BlockSpec((1, O_pad), lambda i: (0, 0)),   # bias: resident
            ],
            out_specs=pl.BlockSpec((tb, O_pad), lambda i: (i, 0)),
        ),
        compiler_params=pltpu.CompilerParams(
            dimension_semantics=("parallel",),   # shard batch axis across TCs (v7x)
        ),
        cost_estimate=cost,
    )(x_p, w_t, b_row)

    # Slice padded batch rows and padded lanes back to the true (B, 10) output.
    return out[:B, :O]


def init_params(key, input_size, out_features=10):
    """Deterministic init matching nn.Linear's default U(-1/sqrt(in), 1/sqrt(in))."""
    kw, kb = jax.random.split(key)
    bound = 1.0 / (input_size ** 0.5)
    # PyTorch stores weight as (out, in); keep that convention.
    w = jax.random.uniform(
        kw, (out_features, input_size), jnp.float32, minval=-bound, maxval=bound
    )
    b = jax.random.uniform(
        kb, (out_features,), jnp.float32, minval=-bound, maxval=bound
    )
    return w, b


# TODO(synk): MLP.train (cross-entropy + Adam step) and compute_acc are training/eval
# utilities, not part of the forward pass; only the Linear forward is a Pallas kernel.

if __name__ == "__main__":
    key = jax.random.PRNGKey(0)
    k_x, k_p, k_x2 = jax.random.split(key, 3)

    batch = 8
    input_size = 32  # MLP(input_size=32)

    x = jax.random.normal(k_x, (batch, input_size), jnp.float32)
    w, b = init_params(k_p, input_size)

    out = mlp_forward(x, w, b)
    out = jax.block_until_ready(out)

    ref = x @ w.T + b
    assert out.shape == (batch, 10)
    assert jnp.allclose(out, ref, atol=1e-5, rtol=1e-5)

    # Second check: non-tile-aligned larger batch exercises batch tiling + padding.
    x2 = jax.random.normal(k_x2, (1000, input_size), jnp.float32)
    out2 = jax.block_until_ready(mlp_forward(x2, w, b))
    ref2 = x2 @ w.T + b
    assert out2.shape == (1000, 10)
    assert jnp.allclose(out2, ref2, atol=1e-5, rtol=1e-5)

    print("KERNEL_OK")
</pallas_src>

<mosaic_0001>
module attributes {stable_mosaic.version = 11 : i64} {
  func.func @linear_kernel(%arg0: i32, %arg1: memref<8x32xf32, #tpu.memory_space<vmem>>, %arg2: memref<32x128xf32, #tpu.memory_space<vmem>>, %arg3: memref<1x128xf32, #tpu.memory_space<vmem>>, %arg4: memref<8x128xf32, #tpu.memory_space<vmem>>) attributes {dimension_semantics = [#tpu.dimension_semantics<parallel>], iteration_bounds = array<i64: 1>, scalar_prefetch = 0 : i64, scratch_operands = 0 : i64, tpu.core_type = #tpu.core_type<tc>, window_params = [{transform_indices = @transform_0, window_bounds = array<i64: 8, 32>}, {pipeline_mode = #tpu.pipeline_mode<synchronous>, transform_indices = @transform_1, window_bounds = array<i64: 32, 128>}, {pipeline_mode = #tpu.pipeline_mode<synchronous>, transform_indices = @transform_2, window_bounds = array<i64: 1, 128>}, {transform_indices = @transform_3, window_bounds = array<i64: 8, 128>}]} {
    %c0 = arith.constant 0 : index
    %c0_0 = arith.constant 0 : index
    %0 = vector.load %arg1[%c0, %c0_0] : memref<8x32xf32, #tpu.memory_space<vmem>>, vector<8x32xf32>
    %c0_1 = arith.constant 0 : index
    %c0_2 = arith.constant 0 : index
    %1 = vector.load %arg2[%c0_1, %c0_2] : memref<32x128xf32, #tpu.memory_space<vmem>>, vector<32x128xf32>
    %cst = arith.constant dense<0.000000e+00> : vector<8x128xf32>
    %2 = tpu.matmul %0, %1, %cst {dimension_numbers = #tpu.dot_dimension_numbers<[1], [0], [0], [1], [0, 0, 1, 1], [], []>} : vector<8x32xf32>, vector<32x128xf32>, vector<8x128xf32> -> vector<8x128xf32>
    %c0_3 = arith.constant 0 : index
    %c0_4 = arith.constant 0 : index
    %3 = vector.load %arg3[%c0_3, %c0_4] : memref<1x128xf32, #tpu.memory_space<vmem>>, vector<1x128xf32>
    %4 = vector.broadcast %3 : vector<1x128xf32> to vector<8x128xf32>
    %5 = arith.addf %2, %4 : vector<8x128xf32>
    %c0_5 = arith.constant 0 : index
    %c0_6 = arith.constant 0 : index
    %6 = vector.load %arg4[%c0_5, %c0_6] : memref<8x128xf32, #tpu.memory_space<vmem>>, vector<8x128xf32>
    tpu.vector_store %arg4[%c0_5, %c0_6], %5 {strides = array<i32>} : memref<8x128xf32, #tpu.memory_space<vmem>>, vector<8x128xf32>,
    return
  }
  func.func @transform_0(%arg0: i32) -> (i32, i32) {
    %c0_i32 = arith.constant 0 : i32
    %c0_i32_0 = arith.constant 0 : i32
    return %arg0, %c0_i32 : i32, i32
  }
  func.func @transform_1(%arg0: i32) -> (i32, i32) {
    %c0_i32 = arith.constant 0 : i32
    %c0_i32_0 = arith.constant 0 : i32
    %c0_i32_1 = arith.constant 0 : i32
    return %c0_i32, %c0_i32_0 : i32, i32
  }
  func.func @transform_2(%arg0: i32) -> (i32, i32) {
    %c0_i32 = arith.constant 0 : i32
    %c0_i32_0 = arith.constant 0 : i32
    %c0_i32_1 = arith.constant 0 : i32
    return %c0_i32, %c0_i32_0 : i32, i32
  }
  func.func @transform_3(%arg0: i32) -> (i32, i32) {
    %c0_i32 = arith.constant 0 : i32
    %c0_i32_0 = arith.constant 0 : i32
    return %arg0, %c0_i32 : i32, i32
  }
}

</mosaic_0001>

<bundles_post_ra>
// kernel: mlp_forward.1
= control target key start
LH: loop header
LB: loop body
LE: loop exit
PB: predicated region body
PF: predicated region fallthrough
CT: control target
= control target key end

     0   :  { %v168_v3 = vmov 0.0|0.0   ;;  %vm169_vm0 = vmmov 0   ;;  %v170_v6 = vmov 0.0   ;;  %s222_s0 = inlined_call_operand.vmem [shape: f32[8,32], index: 0, kind: input, shape index: {}]   ;;  %s223_s1 = inlined_call_operand.vmem [shape: f32[32,128], index: 1, kind: input, shape index: {}]   ;;  %s224_s2 = inlined_call_operand.vmem [shape: f32[1,128], index: 2, kind: input, shape index: {}]   ;;  %s225_s3 = inlined_call_operand.hbm [shape: f32[8,128], index: 3, kind: output, shape index: {}]  }
   0x1   :  { %v16_v0 = vld [vmem:[%s223_s1] sm:$0xff]  ;;  %v17_v1 = vld [vmem:[%s223_s1 + $0x8] sm:$0xff]  ;;  %v18_v2 = vld [vmem:[%s223_s1 + $0x10] sm:$0xff]  ;;  %134 = vmatprep.subr.bf16.mxu0 %v168_v3  ;;  %131 = vmatprep.mubr.msk.f32.mxu0 %vm169_vm0, %v170_v6 }
   0x2   :  { %v135_v4 = vpack.c.bf16 %v17_v1, %v16_v0  ;;  %v19_v5 = vld [vmem:[%s223_s1 + $0x18] sm:$0xff] }
   0x3   :  { %8 = vsyncpa [#allocation3], 0  ;;  %v138_v7 = vpack.c.bf16 %v19_v5, %v18_v2  ;;  %v15_v8 = vld [vmem:[%s222_s0] sm:$0xff]  ;;  %vm27_vm1 = vcmask 261120   ;;  %s171_s24 = smov [#allocation2]  }
   0x4   :  { %136 = vmatpush3.bf16.msra.mxu0 %v135_v4  ;;  %v116_v9 = vld [vmem:[%s224_s2] ss:$0 sm:$0xff]  ;;  %s108_s1 = sshll.u32 %s171_s24, 4  ;;  %s109_s1 = int_to_ptr.vmem [resolvable:$true] %s108_s1 }
   0x5   :  { %137 = vmatprep.subr.bf16.mxu0 %v168_v3  ;;  %s144_s25 = scalar_lea.vmem %s109_s1, 128  ;;  %p149_p1 = scmp.lt.s32.totalorder %s109_s1, %s109_s1 }
   0x6   :  { %p145_p0 = scmp.ne.s32.totalorder %s109_s1, %s144_s25  ;;  %p150_p2 = scmp.lt.s32.totalorder %s144_s25, %s144_s25 }
   0x8   :  { %139 = vmatpush3.bf16.msra.mxu0 %v138_v7  ;;  %p151_p3 = por %p150_p2, %p149_p1 }
   0xa   :  { %p152_p4 = pnand %p151_p3, %p145_p0 }
   0xb   :  { %132 = vmatmul.mubr.msk.f32.vlgmr.msra.gmra.mrb[0].mxu0 %vm27_vm1, %v15_v8 }
  0xde   :  { %v97_v10 = vpop.f32.mrb[0].mxu0 }
  0xdf   :  { %v98_v11 = vadd.f32 %v116_v9, %v97_v10  ;;  %v133_v12 = vpop.f32.mrb[1].mxu0 }
  0xe1   :  { %101 = vst [vmem:[#allocation2] sm:$0xff] %v98_v11 }
  0xe2   :  { %155 = shalt.err (!%p152_p4)
}
  0xe3   :  { %s156_s27 = scalar_lea.hbm %s225_s3, 128 }
  0xe4   :  { %p157_p5 = scmp.ne.s32.totalorder %s225_s3, %s156_s27  ;;  %p160_p6 = scmp.lt.u32.totalorder %s156_s27, %s225_s3 }
  0xe6   :  { %p162_p7 = pnand %p160_p6, %p157_p5 }
  0xe8   :  { %165 = shalt.err (!%p162_p7)
}
  0xe9   :  { %111 = dma.vmem_to_hbm [thread:$0]  %s109_s1, 128, %s225_s3, [#allocation3]  }
  0xea   :  { %166 = dma.done.wait [#allocation3], 128  }
  0xeb   :  { %167 = vsyncadd [#allocation3], 4294967168 }
  0xec   :  { %115 = vsyncpa [#allocation3], 1 }

</bundles_post_ra>
